<compile_context>
chip_gen: v5e
topology: v5e:2x2
jax: 0.10.0
libtpu: 0.0.40
codegen_flags: <defaults>
</compile_context>

<pallas_src>
import functools
import math

import jax
import jax.numpy as jnp
from jax.experimental import pallas as pl
from jax.experimental.pallas import tpu as pltpu


def _rmsnorm_kernel(x_ref, scale_ref, o_ref, *, eps, f32_path):
    x = x_ref[...]                      # (tile_rows, dim)
    scale = scale_ref[...]              # (1, dim), already in the compute dtype
    if f32_path:
        xf = x.astype(jnp.float32)
        sq_sum = jnp.sum(xf * xf, axis=-1, keepdims=True)        # (tile_rows, 1)
        inv = pl.reciprocal(jnp.sqrt(sq_sum) + eps, approx=False)
        o_ref[...] = (xf * inv * scale).astype(o_ref.dtype)
    else:
        # Native-dtype output path (bf16 etc.): only the reduction runs in f32,
        # the wide multiplies and the store stay in the input dtype.
        sq_sum = jnp.sum(jnp.square(x.astype(jnp.float32)), axis=-1,
                         keepdims=True)                           # (tile_rows, 1)
        inv = pl.reciprocal(jnp.sqrt(sq_sum) + eps, approx=True)  # EUP slot
        o_ref[...] = (x * inv.astype(x.dtype)) * scale


def _sublane_multiple(dtype):
    # f32 -> 8, bf16/f16 -> 16, int8/fp8 -> 32 (sub-32-bit packs along sublanes)
    itemsize = jnp.dtype(dtype).itemsize
    return max(8, 8 * (4 // max(itemsize, 1)))


def _vmem_budget_and_limit():
    # Derive per-generation VMEM policy at trace time.
    try:
        cap = int(pltpu.get_tpu_info().vmem_capacity_bytes)
    except Exception:
        cap = 64 * 1024 * 1024          # conservative: smallest gen (v7x per-TC)
    cap = min(cap, 128 * 1024 * 1024)
    limit = max(cap - 16 * 1024 * 1024, 24 * 1024 * 1024)   # headroom for Mosaic
    budget = max((limit * 3) // 5, 16 * 1024 * 1024)        # tile-sizing budget
    return budget, limit


def _pick_tile_rows(rows, dim, dtype, budget):
    itemsize = jnp.dtype(dtype).itemsize
    sub = _sublane_multiple(dtype)
    # Per grid step the pipeline holds ~2 input + 2 output buffers of
    # tile_rows*dim*itemsize bytes plus ~2 f32 intermediate copies.
    per_row_bytes = dim * (4 * itemsize + 8)
    tile_rows = budget // max(per_row_bytes, 1)
    tile_rows = max(sub, min(4096, tile_rows))
    # Keep >= ~4 grid steps where possible (v7x megacore + DMA/compute overlap).
    quarter = -(-rows // 4)
    tile_rows = min(tile_rows, max(sub, ((quarter + sub - 1) // sub) * sub))
    # Never tile past the (sublane-rounded) problem size.
    tile_rows = min(tile_rows, ((rows + sub - 1) // sub) * sub)
    # Sublane constraint: row-block must be a multiple of the packed sublane size.
    tile_rows = max(sub, (tile_rows // sub) * sub)
    return tile_rows


def rmsnorm(x, scale, eps=1e-8, tile_rows=None):
    """x: (..., dim), scale: (dim,). Returns same shape/dtype as x."""
    orig_shape = x.shape
    dim = orig_shape[-1]
    rows = math.prod(orig_shape[:-1]) if len(orig_shape) > 1 else 1

    if dim % 128 != 0:
        # Lane-sparse last dim -> masked partial stores in the kernel would be
        # pathological; plain XLA is the right tool for this edge case.
        xf = x.astype(jnp.float32)
        norm = jnp.sqrt(jnp.sum(xf * xf, axis=-1, keepdims=True))
        return ((xf / (norm + eps)) * scale.astype(jnp.float32)).astype(x.dtype)

    f32_path = jnp.dtype(x.dtype).itemsize >= 4
    compute_dtype = jnp.float32 if f32_path else x.dtype

    x2d = x.reshape(rows, dim)
    scale2d = scale.reshape(1, dim).astype(compute_dtype)  # cast once, not per step

    budget, vmem_limit = _vmem_budget_and_limit()
    if tile_rows is None:
        tile_rows = _pick_tile_rows(rows, dim, x.dtype, budget)

    grid = (pl.cdiv(rows, tile_rows),)

    out = pl.pallas_call(
        functools.partial(_rmsnorm_kernel, eps=eps, f32_path=f32_path),
        out_shape=jax.ShapeDtypeStruct((rows, dim), x.dtype),
        grid_spec=pltpu.PrefetchScalarGridSpec(
            num_scalar_prefetch=0,
            grid=grid,
            in_specs=[
                pl.BlockSpec((tile_rows, dim), lambda i: (i, 0)),
                pl.BlockSpec((1, dim), lambda i: (0, 0)),   # resident scale
            ],
            out_specs=pl.BlockSpec((tile_rows, dim), lambda i: (i, 0)),
        ),
        compiler_params=pltpu.CompilerParams(
            dimension_semantics=("parallel",),
            vmem_limit_bytes=vmem_limit,
        ),
    )(x2d, scale2d)

    return out.reshape(orig_shape)


def _ref_rmsnorm(x, scale, eps):
    xf = x.astype(jnp.float32)
    norm = jnp.linalg.norm(xf, ord=2, axis=-1, keepdims=True)
    return xf / (norm + eps) * scale.astype(jnp.float32)


if __name__ == "__main__":
    key = jax.random.PRNGKey(0)
    k1, k2, k3 = jax.random.split(key, 3)
    eps = 1e-8

    # --- f32 path, lane-dense dim (main Pallas path) ---
    batch, seq, hidden = 2, 8, 128
    x = jax.random.normal(k1, (batch, seq, hidden), dtype=jnp.float32)
    scale = jnp.ones((hidden,), dtype=jnp.float32)   # nn.Parameter(torch.ones(dim))
    out = jax.block_until_ready(rmsnorm(x, scale, eps=eps))
    ref = _ref_rmsnorm(x, scale, eps)
    assert out.shape == x.shape and out.dtype == x.dtype
    assert jnp.allclose(out, ref, atol=1e-5, rtol=1e-5)

    # --- bf16 path (native-dtype output, f32 reduction only) ---
    xb = jax.random.normal(k2, (2, 8, 256), dtype=jnp.bfloat16)
    sb = jnp.ones((256,), dtype=jnp.bfloat16)
    outb = jax.block_until_ready(rmsnorm(xb, sb, eps=eps))
    refb = _ref_rmsnorm(xb, sb, eps)
    assert outb.shape == xb.shape and outb.dtype == xb.dtype
    assert jnp.allclose(outb.astype(jnp.float32), refb, atol=2e-2, rtol=2e-2)

    # --- small-dim guard (dim % 128 != 0 -> XLA fallback, same semantics) ---
    xs = jax.random.normal(k3, (2, 8, 32), dtype=jnp.float32)
    ss = jnp.ones((32,), dtype=jnp.float32)
    outs = jax.block_until_ready(rmsnorm(xs, ss, eps=eps))
    refs = _ref_rmsnorm(xs, ss, eps)
    assert jnp.allclose(outs, refs, atol=1e-5, rtol=1e-5)

    print("KERNEL_OK")
</pallas_src>

<mosaic_0001>
module attributes {stable_mosaic.version = 11 : i64} {
  func.func @_rmsnorm_kernel(%arg0: i32, %arg1: memref<8x128xf32, #tpu.memory_space<vmem>>, %arg2: memref<1x128xf32, #tpu.memory_space<vmem>>, %arg3: memref<8x128xf32, #tpu.memory_space<vmem>>) attributes {dimension_semantics = [#tpu.dimension_semantics<parallel>], iteration_bounds = array<i64: 2>, scalar_prefetch = 0 : i64, scratch_operands = 0 : i64, tpu.core_type = #tpu.core_type<tc>, window_params = [{transform_indices = @transform_0, window_bounds = array<i64: 8, 128>}, {pipeline_mode = #tpu.pipeline_mode<synchronous>, transform_indices = @transform_1, window_bounds = array<i64: 1, 128>}, {transform_indices = @transform_2, window_bounds = array<i64: 8, 128>}]} {
    %c0 = arith.constant 0 : index
    %c0_0 = arith.constant 0 : index
    %0 = vector.load %arg1[%c0, %c0_0] : memref<8x128xf32, #tpu.memory_space<vmem>>, vector<8x128xf32>
    %c0_1 = arith.constant 0 : index
    %c0_2 = arith.constant 0 : index
    %1 = vector.load %arg2[%c0_1, %c0_2] : memref<1x128xf32, #tpu.memory_space<vmem>>, vector<1x128xf32>
    %2 = arith.mulf %0, %0 : vector<8x128xf32>
    %cst = arith.constant dense<0.000000e+00> : vector<8xf32>
    %3 = vector.multi_reduction <add>, %2, %cst [1] : vector<8x128xf32> to vector<8xf32>
    %4 = vector.shape_cast %3 : vector<8xf32> to vector<8x1xf32>
    %5 = math.sqrt %4 : vector<8x1xf32>
    %cst_3 = arith.constant 9.99999993E-9 : f32
    %6 = vector.broadcast %cst_3 : f32 to vector<8x1xf32>
    %7 = arith.addf %5, %6 : vector<8x1xf32>
    %8 = tpu.reciprocal %7 : vector<8x1xf32> -> vector<8x1xf32>
    %9 = vector.broadcast %8 : vector<8x1xf32> to vector<8x128xf32>
    %10 = arith.mulf %0, %9 : vector<8x128xf32>
    %11 = vector.broadcast %1 : vector<1x128xf32> to vector<8x128xf32>
    %12 = arith.mulf %10, %11 : vector<8x128xf32>
    %c0_4 = arith.constant 0 : index
    %c0_5 = arith.constant 0 : index
    %13 = vector.load %arg3[%c0_4, %c0_5] : memref<8x128xf32, #tpu.memory_space<vmem>>, vector<8x128xf32>
    tpu.vector_store %arg3[%c0_4, %c0_5], %12 {strides = array<i32>} : memref<8x128xf32, #tpu.memory_space<vmem>>, vector<8x128xf32>,
    return
  }
  func.func @transform_0(%arg0: i32) -> (i32, i32) {
    %c0_i32 = arith.constant 0 : i32
    %c0_i32_0 = arith.constant 0 : i32
    return %arg0, %c0_i32 : i32, i32
  }
  func.func @transform_1(%arg0: i32) -> (i32, i32) {
    %c0_i32 = arith.constant 0 : i32
    %c0_i32_0 = arith.constant 0 : i32
    %c0_i32_1 = arith.constant 0 : i32
    return %c0_i32, %c0_i32_0 : i32, i32
  }
  func.func @transform_2(%arg0: i32) -> (i32, i32) {
    %c0_i32 = arith.constant 0 : i32
    %c0_i32_0 = arith.constant 0 : i32
    return %arg0, %c0_i32 : i32, i32
  }
}

</mosaic_0001>

<bundles_post_ra>
// kernel: tpu_custom_call.1
= control target key start
LH: loop header
LB: loop body
LE: loop exit
PB: predicated region body
PF: predicated region fallthrough
CT: control target
= control target key end

     0   :  { %7 = vsyncpa [#allocation3], 0  ;;  %s676_s0 = inlined_call_operand.hbm [shape: f32[16,128], index: 0, kind: input, shape index: {}]   ;;  %s677_s1 = inlined_call_operand.hbm [shape: f32[1,128], index: 1, kind: input, shape index: {}]   ;;  %s678_s2 = inlined_call_operand.hbm [shape: f32[16,128], index: 2, kind: output, shape index: {}]  }
   0x1   :  { %9 = vsyncpa [#allocation3 + $0x1], 0 }
   0x2   :  { %10 = vsyncpa [#allocation6], 0 }
   0x3   :  { %11 = vsyncpa [#allocation4], 0 }
   0x4   :  { %13 = vsyncpa [#allocation4 + $0x1], 0  ;;  %s534_s9 = smov 0   ;;  %s536_s10 = smov 0  }
   0x5   :  { %s538_s11 = smov 0   ;;  %s540_s12 = smov 0  }
   0x6 LB: > { %s555_s13 = sadd.s32 4294967295, %s516_s12   ;;  %s310_s14 = sadd.s32 4294967294, %s516_s12   ;;  %s516_s12 = sphi %s540_s12, %s688_s12   ;;  %s512_s11 = sphi %s538_s11, %s687_s11   ;;  %s508_s10 = sphi %s536_s10, %s686_s10   ;;  %s504_s9 = sphi %s534_s9, %s685_s9  }
   0x7   : > { %p39_p0 = scmp.ne.s32.totalorder %s508_s10, %s504_s9  ;;  %p40_p1 = scmp.eq.s32.totalorder %s555_s13, 0 }
   0x8   : > { %p84_p2 = scmp.eq.s32.totalorder %s555_s13, 1  ;;  %p90_p3 = scmp.eq.s32.totalorder %s310_s14, 1 }
   0x9   : > { %p564_p4 = por %p40_p1, %p39_p0  ;;  %p311_p5 = scmp.ge.s32.totalorder %s516_s12, 1 }
   0xa   : > { %p569_p6 = por %p90_p3, %p39_p0  ;;  %p97_p7 = scmp.lt.s32.totalorder %s516_s12, 3 }
   0xb   : > { %s109_s19 = sshll.u32 %s677_s1, 4  ;;  %s518_s21 = smov [#allocation5]   ;;  %s110_s19 = int_to_ptr.hbm [resolvable:$true] %s109_s19 }
   0xc   : > { %p577_p8 = pnand %p311_p5, %p97_p7  ;;  %s111_s22 = sshll.u32 %s518_s21, 4  ;;  %s112_s22 = int_to_ptr.vmem [resolvable:$true] %s111_s22 }
   0xd   : > { %s587_s23 = sadd.s32 1, %s516_s12   ;;  %s26_s24 = sadd.s32 1, %s512_s11 }
   0xe   : > { %p332_p10 = pneg %p577_p8  ;;  %s23_s25 = ssub.s32 %s516_s12, %s587_s23 }
   0xf   : > { %p24_p12 = scmp.eq.s32.totalorder %s23_s25, 0  ;;  %p33_p13 = scmp.ne.s32.totalorder %s512_s11, %s508_s10 }
  0x10   : > { %p333_p11 = pnand %p332_p10, %p40_p1  ;;  %p34_p0 = scmp.eq.s32.totalorder %s516_s12, 0 }
  0x11   : > { %s596_s26 = scalar_select %p24_p12, %s512_s11, %s26_s24  }
  0x12   : > { %335 = dma.hbm_to_vmem [thread:$0]  (!%p333_p11), %s110_s19, 16, %s112_s22, [#allocation6]  }
  0x13   : > { %p600_p3 = por %p84_p2, %p33_p13  ;;  %p345_p5 = scmp.lt.s32.totalorder %s516_s12, 2 }
  0x14   : > { %s122_s28 = sand.u32 1, %s512_s11   ;;  %s315_s29 = sshll.u32 %s516_s12, 3 }
  0x15   : > { %p35_p7 = por %p34_p0, %p33_p13  ;;  %s314_s30 = sshll.u32 %s122_s28, 3 }
  0x16   : > { %s130_s5 = scalar_lea.hbm %s676_s0, %s315_s29  ;;  %s126_s7 = scalar_lea.vmem [#allocation2], %s314_s30 }
  0x17   : > { %s132_s6 = sshll.u32 %s130_s5, 4  ;;  %s134_s8 = sshll.u32 %s126_s7, 4  ;;  %s133_s6 = int_to_ptr.hbm [resolvable:$true] %s132_s6  ;;  %s135_s8 = int_to_ptr.vmem [resolvable:$true] %s134_s8 }
  0x18   : > { %p610_p10 = pnand %p345_p5, %p35_p7  ;;  %s123_s17 = scalar_lea.sflag [#allocation3], %s122_s28 }
  0x19   : > { %s416_s18 = sshra.s32 %s133_s6, 4  ;;  %s423_s24 = scalar_lea.hbm %s676_s0, 16  ;;  %s417_s18 = int_to_ptr.hbm [resolvable:$true] %s416_s18 }
  0x1a   : > { %s418_s19 = scalar_lea.hbm %s417_s18, 8  ;;  %p420_p11 = pneg %p610_p10 }
  0x1b   : > { %p419_p2 = scmp.ne.s32.totalorder %s417_s18, %s418_s19  ;;  %p424_p0 = scmp.lt.s32.totalorder %s417_s18, %s676_s0 }
  0x1c   : > { %p425_p5 = scmp.lt.s32.totalorder %s423_s24, %s418_s19 }
  0x1d   : > { %p421_p12 = pnand %p420_p11, %p419_p2 }
  0x1e   : > { %p426_p7 = por %p425_p5, %p424_p0 }
  0x1f   : > { %p422_p13 = pneg %p421_p12 }
  0x21   : > { %p427_p9 = pnand %p426_p7, %p422_p13 }
  0x23   : > { %430 = shalt.err (!%p427_p9)
}
  0x24   : > { %339 = dma.hbm_to_vmem [thread:$0]  (!%p610_p10), %s133_s6, 128, %s135_s8, %s123_s17  }
  0x25   : > { %143 = sbr.rel (%p577_p8) target bundleno = 211 (0xd3), region = 28  ;;  %s627_s28 = sand.u32 (!%p577_p8), 1, %s508_s10  }
  0x26   : > { %s317_s30 = sshll.u32 (!%p577_p8), %s627_s28, 3  ;;  %s146_s3 = scalar_lea.sflag (!%p577_p8), [#allocation3], %s627_s28 }
  0x27   : > { %s149_s4 = scalar_lea.vmem (!%p577_p8), [#allocation2], %s317_s30 }
  0x2a   : > { %491 = dma.done.wait (%p564_p4), %s146_s3, 128  }
  0x2b   : > { %493 = vsyncadd (%p564_p4), %s146_s3, 4294967168 }
  0x2c   : > { %495 = dma.done.wait (%p40_p1), [#allocation6], 16  }
  0x2d   : > { %497 = vsyncadd (%p40_p1), [#allocation6], 4294967280  ;;  %v176_v0 = vld [vmem:[%s149_s4] sm:$0xff]  ;;  %s321_s15 = sshll.u32 %s555_s13, 3  ;;  %v381_v23 = vld [vmem:[#allocation5] ss:$0 sm:$0xff] }
  0x2e   : > { %v178_v1 = vmul.f32 %v176_v0, %v176_v0  ;;  %s225_s6 = scalar_lea.hbm %s678_s2, %s321_s15  ;;  %s175_s7 = scalar_lea.vmem [#allocation7], %s317_s30 }
  0x2f   : > { %s227_s13 = sshll.u32 %s175_s7, 4  ;;  %s229_s8 = sshll.u32 %s225_s6, 4  ;;  %s228_s13 = int_to_ptr.vmem [resolvable:$true] %s227_s13  ;;  %s230_s8 = int_to_ptr.hbm [resolvable:$true] %s229_s8 }
  0x30   : > { %179 = vadd.xlane.f32.xlu0 %v178_v1  ;;  %s215_s14 = scalar_lea.sflag [#allocation4], %s627_s28  ;;  %s460_s17 = sshra.s32 %s230_s8, 4  ;;  %s461_s17 = int_to_ptr.hbm [resolvable:$true] %s460_s17 }
  0x31   : > { %s462_s18 = scalar_lea.hbm %s461_s17, 8  ;;  %s466_s22 = scalar_lea.hbm %s678_s2, 16 }
  0x32   : > { %p463_p1 = scmp.ne.s32.totalorder %s461_s17, %s462_s18  ;;  %p467_p9 = scmp.lt.s32.totalorder %s461_s17, %s678_s2 }
  0x33   : > { %p468_p10 = scmp.lt.s32.totalorder %s466_s22, %s462_s18 }
  0x34   : > { %p464_p4 = pnand %p463_p1, %p600_p3 }
  0x35   : > { %p469_p2 = por %p468_p10, %p467_p9 }
  0x36   : > { %p465_p8 = pneg %p464_p4 }
  0x38   : > { %p470_p11 = pnand %p469_p2, %p465_p8 }
  0xa3   : > { %v180_v2 = vpop.xlane.xlu0 %179 }
  0xa4   : > { %382 = vrsqrt.f32 %v180_v2  ;;  %vm188_vm0 = vcmp.eq.f32.partialorder %v180_v2, inf  ;;  %v191_v10 = vand.u32 2147483648, %v180_v2  ;;  %vm190_vm1 = vcmp.eq.f32.partialorder %v180_v2, 0.0 }
  0xaa   : > { %v383_v3 = vpop.eup %382 }
  0xab   : > { %v182_v4 = vmul.f32 %v383_v3, %v180_v2 }
  0xad   : > { %v183_v5 = vmul.f32 %v383_v3, %v182_v4 }
  0xaf   : > { %v184_v6 = vmul.f32 0.5, %v183_v5 }
  0xb1   : > { %v185_v7 = vsub.f32 1.5, %v184_v6 }
  0xb3   : > { %v186_v8 = vmul.f32 %v383_v3, %v185_v7 }
  0xb5   : > { %v187_v9 = vmul.f32 %v186_v8, %v180_v2 }
  0xb7   : > { %v189_v11 = vsel %vm188_vm0, %v180_v2, %v187_v9 }
  0xb8   : > { %v192_v12 = vsel %vm190_vm1, %v191_v10, %v189_v11 }
  0xb9   : > { %v193_v13 = vadd.f32 1e-08, %v192_v12 }
  0xbb   : > { %384 = vrcp.f32 %v193_v13  ;;  %v205_v17 = vand.u32 2147483648, %v193_v13  ;;  %v203_v19 = vand.u32 2147483647, %v193_v13  ;;  %vm199_vm3 = vweird.f32 %v193_v13 }
  0xbd   : > { %v206_v21 = vor.u32 1.1754944e-38, %v205_v17  ;;  %vm204_vm5 = vcmp.eq.f32.partialorder %v203_v19, 8.507059e+37 }
  0xc1   : > { %v385_v14 = vpop.eup %384 }
  0xc2   : > { %v195_v15 = vmul.f32 %v385_v14, %v193_v13  ;;  %vm200_vm2 = vweird.f32 %v385_v14 }
  0xc3   : > { %vm201_vm4 = vmor %vm199_vm3, %vm200_vm2 }
  0xc4   : > { %v196_v16 = vsub.f32 1.0, %v195_v15 }
  0xc6   : > { %v197_v18 = vmul.f32 %v385_v14, %v196_v16 }
  0xc8   : > { %v198_v20 = vadd.f32 %v385_v14, %v197_v18 }
  0xca   : > { %v202_v22 = vsel %vm201_vm4, %v385_v14, %v198_v20 }
  0xcb   : > { %v207_v24 = vsel %vm204_vm5, %v206_v21, %v202_v22 }
  0xcc   : > { %v208_v25 = vmul.f32 %v207_v24, %v176_v0 }
  0xce   : > { %v212_v26 = vmul.f32 %v381_v23, %v208_v25 }
  0xd0   : > { %213 = vst [vmem:[%s175_s7] sm:$0xff] %v212_v26 }
  0xd1   : > { %473 = shalt.err (!%p470_p11)
}
  0xd2   : > { %330 = dma.vmem_to_hbm [thread:$0]  (%p600_p3), %s228_s13, 128, %s230_s8, %s215_s14  }
  0xd3 PF: > { %s241_s29 = sand.u32 1, %s504_s9   ;;  %p684_p12 = scmp.ge.s32.totalorder %s516_s12, 2 }
  0xd4   : > { %s242_s28 = scalar_lea.sflag [#allocation4], %s241_s29 }
  0xd5   : > { %p341_p13 = pnand %p684_p12, %p569_p6 }
  0xd7   : > { %p342_p0 = pneg %p341_p13 }
  0xd9   : > { %499 = dma.done.wait (%p342_p0), %s242_s28, 128  }
  0xda   : > { %501 = vsyncadd (%p342_p0), %s242_s28, 4294967168  ;;  %p16_p5 = scmp.ge.s32.totalorder %s587_s23, 4   ;;  %s685_s9 = smov %s508_s10 }
  0xdb   : > { %s686_s10 = smov %s512_s11  ;;  %s687_s11 = smov %s596_s26 }
  0xdc   : > { %s688_s12 = smov %s587_s23  ;;  %18 = sbr.rel (!%p16_p5) target bundleno = 6 (0x6), region = 77 }
  0xe1   :  { %248 = vsyncpa [#allocation3], 1 }
  0xe2   :  { %250 = vsyncpa [#allocation3 + $0x1], 1 }
  0xe3   :  { %251 = vsyncpa [#allocation6], 1 }
  0xe4   :  { %252 = vsyncpa [#allocation4], 1 }
  0xe5   :  { %254 = vsyncpa [#allocation4 + $0x1], 1 }

</bundles_post_ra>
